<compile_context>
chip_gen: v7x
topology: tpu7x:2x2x1
jax: 0.10.0
libtpu: 0.0.40
codegen_flags: <defaults>
</compile_context>

<pallas_src>
import functools

import jax
import jax.numpy as jnp
from jax import lax
from jax.experimental import pallas as pl
from jax.experimental.pallas import tpu as pltpu


def _round_up(x, m):
    return ((x + m - 1) // m) * m


def _cross_entropy_kernel(logits_ref, targets_ref, out_ref, *, n_total):
    # logits_ref : (TN, C) native dtype in VMEM (one batch tile)
    # targets_ref: (TN, 1) int32 in VMEM (padded rows hold -1)
    # out_ref    : (1, 1) float32 in SMEM -- resident accumulator across grid
    i = pl.program_id(0)

    x = logits_ref[...].astype(jnp.float32)           # (TN, C), f32 compute
    tn, c = x.shape
    tgt = targets_ref[...]                            # (TN, 1) int32

    # Per-row (lane-axis) reductions -> XLU; keepdims keeps everything (TN, 1).
    m = jnp.max(x, axis=1, keepdims=True)             # (TN, 1)
    sum_exp = jnp.sum(jnp.exp(x - m), axis=1, keepdims=True)
    lse = jnp.log(sum_exp)                            # (TN, 1)

    # x[i, t_i] via cmp+select masked row sum (no float one-hot, no logp temp).
    col = lax.broadcasted_iota(jnp.int32, (tn, c), 1)
    x_tgt = jnp.sum(jnp.where(col == tgt, x, 0.0), axis=1, keepdims=True)

    # Per-row NLL contribution: -(logp[i, t_i]) = m + lse - x_tgt.
    # Padded rows (tgt < 0) contribute zero.
    valid = tgt >= 0
    contrib = jnp.where(valid, m + lse - x_tgt, 0.0)  # (TN, 1)
    partial = jnp.sum(contrib)                        # small sublane sum

    @pl.when(i == 0)
    def _():
        out_ref[0, 0] = 0.0

    out_ref[0, 0] += partial

    @pl.when(i == pl.num_programs(0) - 1)
    def _():
        out_ref[0, 0] = out_ref[0, 0] / jnp.float32(n_total)


def cross_entropy_loss(logits, targets, *, block_n=512):
    """Mean-reduced cross-entropy loss, equivalent to the PyTorch module's forward."""
    n, c = logits.shape

    # Batch tile: multiple of 8 sublanes, capped at block_n rows.
    tn = min(block_n, _round_up(n, 8))
    tn = max(8, (tn // 8) * 8)
    n_pad = _round_up(n, tn)

    targets_2d = targets.astype(jnp.int32).reshape(n, 1)
    if n_pad != n:
        logits = jnp.pad(logits, ((0, n_pad - n), (0, 0)))
        targets_2d = jnp.pad(targets_2d, ((0, n_pad - n), (0, 0)),
                             constant_values=-1)  # sentinel: ignored rows

    grid = (n_pad // tn,)
    kernel = functools.partial(_cross_entropy_kernel, n_total=n)

    out = pl.pallas_call(
        kernel,
        out_shape=jax.ShapeDtypeStruct((1, 1), jnp.float32),
        grid=grid,
        in_specs=[
            pl.BlockSpec((tn, c), lambda i: (i, 0)),   # logits tile, native dtype
            pl.BlockSpec((tn, 1), lambda i: (i, 0)),   # targets tile
        ],
        out_specs=pl.BlockSpec((1, 1), lambda i: (0, 0),
                               memory_space=pltpu.MemorySpace.SMEM),
        compiler_params=pltpu.CompilerParams(
            dimension_semantics=("arbitrary",)),       # resident scalar accumulator
        cost_estimate=pl.CostEstimate(
            flops=4 * n_pad * c,
            transcendentals=n_pad * c,
            bytes_accessed=n_pad * c * logits.dtype.itemsize + n_pad * 4 + 4,
        ),
    )(logits, targets_2d)
    return out[0, 0]


if __name__ == "__main__":
    key = jax.random.PRNGKey(0)
    k_logits, k_targets = jax.random.split(key)

    N, C = 8, 32  # small batch, 32 classes (consistent with the classifier head)
    logits = jax.random.normal(k_logits, (N, C), dtype=jnp.float32)
    targets = jax.random.randint(k_targets, (N,), 0, C, dtype=jnp.int32)

    loss = cross_entropy_loss(logits, targets)
    jax.block_until_ready(loss)

    # sanity check against pure-JAX reference
    logp_ref = jax.nn.log_softmax(logits, axis=1)
    ref = -jnp.mean(logp_ref[jnp.arange(N), targets])
    assert jnp.allclose(loss, ref, atol=1e-5, rtol=1e-5), (loss, ref)

    print("KERNEL_OK")
</pallas_src>

<mosaic_0001>
module attributes {stable_mosaic.version = 11 : i64} {
  func.func @_cross_entropy_kernel(%arg0: i32, %arg1: memref<8x32xf32, #tpu.memory_space<vmem>>, %arg2: memref<8x1xi32, #tpu.memory_space<vmem>>, %arg3: memref<1x1xf32, #tpu.memory_space<smem>>) attributes {dimension_semantics = [#tpu.dimension_semantics<arbitrary>], iteration_bounds = array<i64: 1>, scalar_prefetch = 0 : i64, scratch_operands = 0 : i64, tpu.core_type = #tpu.core_type<tc>, window_params = [{transform_indices = @transform_0, window_bounds = array<i64: 8, 32>}, {transform_indices = @transform_1, window_bounds = array<i64: 8, 1>}, {transform_indices = @transform_2, window_bounds = array<i64: 1, 1>}]} {
    %c0 = arith.constant 0 : index
    %c0_0 = arith.constant 0 : index
    %0 = vector.load %arg1[%c0, %c0_0] : memref<8x32xf32, #tpu.memory_space<vmem>>, vector<8x32xf32>
    %c0_1 = arith.constant 0 : index
    %c0_2 = arith.constant 0 : index
    %1 = vector.load %arg2[%c0_1, %c0_2] : memref<8x1xi32, #tpu.memory_space<vmem>>, vector<8x1xi32>
    %cst = arith.constant dense<0xFF800000> : vector<8xf32>
    %2 = vector.multi_reduction <maximumf>, %0, %cst [1] : vector<8x32xf32> to vector<8xf32>
    %3 = vector.shape_cast %2 : vector<8xf32> to vector<8x1xf32>
    %4 = vector.broadcast %3 : vector<8x1xf32> to vector<8x32xf32>
    %5 = arith.subf %0, %4 : vector<8x32xf32>
    %6 = math.exp %5 : vector<8x32xf32>
    %cst_3 = arith.constant dense<0.000000e+00> : vector<8xf32>
    %7 = vector.multi_reduction <add>, %6, %cst_3 [1] : vector<8x32xf32> to vector<8xf32>
    %8 = vector.shape_cast %7 : vector<8xf32> to vector<8x1xf32>
    %9 = math.log %8 : vector<8x1xf32>
    %10 = tpu.iota {dimensions = array<i32: 1>} : vector<8x32xi32>
    %11 = vector.broadcast %1 : vector<8x1xi32> to vector<8x32xi32>
    %12 = arith.cmpi eq, %10, %11 : vector<8x32xi32>
    %cst_4 = arith.constant 0.000000e+00 : f32
    %13 = vector.broadcast %cst_4 : f32 to vector<8x32xf32>
    %14 = arith.select %12, %0, %13 : vector<8x32xi1>, vector<8x32xf32>
    %cst_5 = arith.constant dense<0.000000e+00> : vector<8xf32>
    %15 = vector.multi_reduction <add>, %14, %cst_5 [1] : vector<8x32xf32> to vector<8xf32>
    %16 = vector.shape_cast %15 : vector<8xf32> to vector<8x1xf32>
    %c0_i32 = arith.constant 0 : i32
    %17 = vector.broadcast %c0_i32 : i32 to vector<8x1xi32>
    %18 = arith.cmpi sge, %1, %17 : vector<8x1xi32>
    %19 = arith.addf %3, %9 : vector<8x1xf32>
    %20 = arith.subf %19, %16 : vector<8x1xf32>
    %cst_6 = arith.constant 0.000000e+00 : f32
    %21 = vector.broadcast %cst_6 : f32 to vector<8x1xf32>
    %22 = arith.select %18, %20, %21 : vector<8x1xi1>, vector<8x1xf32>
    %23 = vector.shape_cast %22 : vector<8x1xf32> to vector<1x8x1xf32>
    %cst_7 = arith.constant dense<0.000000e+00> : vector<1xf32>
    %24 = vector.multi_reduction <add>, %23, %cst_7 [1, 2] : vector<1x8x1xf32> to vector<1xf32>
    %25 = vector.shape_cast %24 : vector<1xf32> to vector<1x1x1xf32>
    %26 = vector.extract %25[0, 0, 0] : f32 from vector<1x1x1xf32>
    %c0_i32_8 = arith.constant 0 : i32
    %27 = arith.cmpi eq, %arg0, %c0_i32_8 : i32
    %28 = arith.extui %27 : i1 to i32
    %c0_i32_9 = arith.constant 0 : i32
    %29 = arith.cmpi ne, %28, %c0_i32_9 : i32
    scf.if %29 {
      %cst_16 = arith.constant 0.000000e+00 : f32
      %c0_17 = arith.constant 0 : index
      %c0_18 = arith.constant 0 : index
      %36 = memref.load %arg3[%c0_17, %c0_18] : memref<1x1xf32, #tpu.memory_space<smem>>
      memref.store %cst_16, %arg3[%c0_17, %c0_18] : memref<1x1xf32, #tpu.memory_space<smem>>
    } else {
    }
    %c0_10 = arith.constant 0 : index
    %c0_11 = arith.constant 0 : index
    %30 = memref.load %arg3[%c0_10, %c0_11] : memref<1x1xf32, #tpu.memory_space<smem>>
    %31 = arith.addf %30, %26 : f32
    %c0_12 = arith.constant 0 : index
    %c0_13 = arith.constant 0 : index
    %32 = memref.load %arg3[%c0_12, %c0_13] : memref<1x1xf32, #tpu.memory_space<smem>>
    memref.store %31, %arg3[%c0_12, %c0_13] : memref<1x1xf32, #tpu.memory_space<smem>>
    %c0_i32_14 = arith.constant 0 : i32
    %33 = arith.cmpi eq, %arg0, %c0_i32_14 : i32
    %34 = arith.extui %33 : i1 to i32
    %c0_i32_15 = arith.constant 0 : i32
    %35 = arith.cmpi ne, %34, %c0_i32_15 : i32
    scf.if %35 {
      %c0_16 = arith.constant 0 : index
      %c0_17 = arith.constant 0 : index
      %36 = memref.load %arg3[%c0_16, %c0_17] : memref<1x1xf32, #tpu.memory_space<smem>>
      %cst_18 = arith.constant 8.000000e+00 : f32
      %37 = arith.divf %36, %cst_18 : f32
      %c0_19 = arith.constant 0 : index
      %c0_20 = arith.constant 0 : index
      %38 = memref.load %arg3[%c0_19, %c0_20] : memref<1x1xf32, #tpu.memory_space<smem>>
      memref.store %37, %arg3[%c0_19, %c0_20] : memref<1x1xf32, #tpu.memory_space<smem>>
    } else {
    }
    return
  }
  func.func @transform_0(%arg0: i32) -> (i32, i32) {
    %c0_i32 = arith.constant 0 : i32
    %c0_i32_0 = arith.constant 0 : i32
    return %arg0, %c0_i32 : i32, i32
  }
  func.func @transform_1(%arg0: i32) -> (i32, i32) {
    %c0_i32 = arith.constant 0 : i32
    %c0_i32_0 = arith.constant 0 : i32
    return %arg0, %c0_i32 : i32, i32
  }
  func.func @transform_2(%arg0: i32) -> (i32, i32) {
    %c0_i32 = arith.constant 0 : i32
    %c0_i32_0 = arith.constant 0 : i32
    %c0_i32_1 = arith.constant 0 : i32
    return %c0_i32, %c0_i32_0 : i32, i32
  }
}

</mosaic_0001>

<bundles_post_ra>
// kernel: tpu_custom_call.1
= control target key start
LH: loop header
LB: loop body
LE: loop exit
PB: predicated region body
PF: predicated region fallthrough
CT: control target
= control target key end

     0   :  { %vm14_vm0 = vcmask 261120   ;;  %s142_s0 = inlined_call_operand.vmem [shape: f32[8,32], index: 0, kind: input, shape index: {}]   ;;  %s143_s1 = inlined_call_operand.vmem [shape: s32[8,1], index: 1, kind: input, shape index: {}]   ;;  %s144_s2 = inlined_call_operand.hbm [shape: f32[1,1], index: 2, kind: output, shape index: {}]  }
   0x1   :  { %v12_v0 = vld [vmem:[%s142_s0] sm:$0xff] }
   0x2   :  { %7 = vsyncpa [#allocation3], 0  ;;  %v15_v1 = vsel %vm14_vm0, %v12_v0, -inf  ;;  %v104_v2 = vmov 0   ;;  %v13_v3 = vld [vmem:[%s143_s1] sm:$0xff]  ;;  %v26_v7 = vlaneseq  ;;  %vm40_vm3 = vcmask 7168  }
   0x3   :  { %87 = vset.pattern.permute.xlu0 %v104_v2  ;;  %vm36_vm2 = vcmp.ge.s32.totalorder %v13_v3, 0  ;;  %s92_s15 = scalar_lea.hbm %s144_s2, 16 }
   0x4   :  { %16 = vmax.xlane.f32.xlu0 %v15_v1  ;;  %v27_v8 = vand.u32 127, %v26_v7  ;;  %p93_p0 = scmp.ne.s32.totalorder %s144_s2, %s92_s15  ;;  %p96_p1 = scmp.lt.u32.totalorder %s92_s15, %s144_s2 }
   0x6   :  { %p98_p2 = pnand %p96_p1, %p93_p0 }
  0x1a   :  { %29 = vperm.xlu0 %87, %v13_v3  }
  0x91   :  { %v17_v4 = vpop.xlane.xlu0 %16 }
  0x92   :  { %v18_v5 = vsub.f32 %v12_v0, %v17_v4 }
  0x94   :  { %v19_v6 = vmul.f32 1.442695, %v18_v5 }
  0x96   :  { %88 = vpow2.f32 %v19_v6 }
  0x99   :  { %v30_v9 = vpop.permute.xlu0 %29 }
  0x9a   :  { %vm31_vm1 = vcmp.eq.s32.totalorder %v27_v8, %v30_v9 }
  0x9b   :  { %v32_v11 = vsel %vm31_vm1, %v12_v0, 0.0 }
  0x9c   :  { %v33_v13 = vsel %vm14_vm0, %v32_v11, 0.0 }
  0xa0   :  { %v89_v10 = vpop.eup %88 }
  0xa1   :  { %v21_v12 = vsel %vm14_vm0, %v89_v10, 0.0 }
  0xa2   :  { %22 = vadd.xlane.f32.xlu1 %v21_v12 }
  0xa6   :  { %34 = vadd.xlane.f32.xlu1 %v33_v13 }
 0x12f   :  { %v23_v14 = vpop.xlane.xlu1 %22 }
 0x130   :  { %90 = vlog2.f32 %v23_v14 }
 0x133   :  { %v35_v17 = vpop.xlane.xlu1 %34 }
 0x13a   :  { %v91_v15 = vpop.eup %90 }
 0x13b   :  { %v25_v16 = vmul.f32 0.6931472, %v91_v15 }
 0x13d   :  { %v37_v18 = vadd.f32 %v25_v16, %v17_v4 }
 0x13f   :  { %v38_v19 = vsub.f32 %v37_v18, %v35_v17 }
 0x141   :  { %v39_v20 = vsel %vm36_vm2, %v38_v19, 0.0 }
 0x142   :  { %v41_v21 = vsel %vm40_vm3, %v39_v20, 0.0 }
 0x143   :  { %42 = vadd.xlane.f32.xlu1 %v41_v21 }
 0x1d0   :  { %v43_v22 = vpop.xlane.xlu1 %42 }
 0x1d1   :  { %v44_v23 = vrot.slane %v43_v22, 4 }
 0x1d3   :  { %v45_v24 = vadd.f32 %v44_v23, %v43_v22 }
 0x1d5   :  { %v46_v25 = vrot.slane %v45_v24, 2 }
 0x1d7   :  { %v47_v26 = vadd.f32 %v46_v25, %v45_v24 }
 0x1d9   :  { %v48_v27 = vrot.slane %v47_v26, 1 }
 0x1db   :  { %v49_v28 = vadd.f32 %v48_v27, %v47_v26 }
 0x1dd   :  { %82 = vpush %v49_v28 }
 0x20e   :  { %s83_s0 = spop %82 }
 0x20f   :  { %s67_s1 = smul.f32 0.125, %s83_s0 }
 0x211   :  { %68 = sst [smem:[#allocation2]] %s67_s1 }
 0x212   :  { %101 = shalt.err (!%p98_p2)
}
 0x213   :  { %s105_s20 = smov [#allocation2]  }
 0x214   :  { %76 = dma.smem_to_hbm %s105_s20, 16, %s144_s2, [#allocation3]  }
 0x215   :  { %102 = dma.done.wait [#allocation3], 16  }
 0x216   :  { %103 = vsyncadd [#allocation3], 4294967280 }
 0x217   :  { %80 = sfence }
 0x218   :  { %81 = vsyncpa [#allocation3], 1 }

</bundles_post_ra>
